<compile_context>
chip_gen: v7x
topology: tpu7x:2x2x1
jax: 0.10.0
libtpu: 0.0.40
codegen_flags: <defaults>
</compile_context>

<pallas_src>
import functools

import jax
import jax.numpy as jnp
from jax.experimental import pallas as pl
from jax.experimental.pallas import tpu as pltpu


def _round_up(v, m):
    return ((v + m - 1) // m) * m


def _namegen_kernel(x_ref, w1_ref, b1_ref, w2_ref, b2_ref, out_ref, hid_ref, *, mxu_dtype):
    # hidden = relu(x @ W1 + b1)      (i2o layer)
    x = x_ref[...].astype(mxu_dtype)
    h = jnp.dot(x, w1_ref[...].astype(mxu_dtype), preferred_element_type=jnp.float32)
    h = jnp.maximum(h + b1_ref[...], 0.0)          # bias/ReLU in f32 (v5e has no bf16 VPU)
    hid_ref[...] = h.astype(hid_ref.dtype)         # lane-dense (last dim padded to 128k)

    # logits = hidden @ W2 + b2       (o2o layer)
    logits = jnp.dot(h.astype(mxu_dtype), w2_ref[...].astype(mxu_dtype),
                     preferred_element_type=jnp.float32) + b2_ref[...]

    # dropout(p=0.1): identity in eval mode (inference semantics)
    # TODO(synk): training-mode dropout (seed pltpu.prng_seed once, mask via pltpu.prng_random_bits).

    # log_softmax over the padded lane-dense last dim; padded columns carry a -1e30 bias,
    # so exp(pad - m) == 0 and they do not perturb the result for the real columns.
    m = jnp.max(logits, axis=1, keepdims=True)
    lse = m + jnp.log(jnp.sum(jnp.exp(logits - m), axis=1, keepdims=True))
    out_ref[...] = (logits - lse).astype(out_ref.dtype)


def _forward_rows(x_rows, w1, b1, w2, b2, *, mxu_dtype=jnp.float32, block_rows=256):
    """Batched forward over N independent rows in a single pallas_call.

    x_rows: (N, input_size) f32
    w1: (input_size, hidden_size)   b1: (hidden_size,) or (1, hidden_size)
    w2: (hidden_size, output_size)  b2: (output_size,) or (1, output_size)
    Returns (log_softmax (N, output_size), hidden (N, hidden_size)).
    """
    N, input_size = x_rows.shape
    hidden_size = w1.shape[1]
    output_size = w2.shape[1]

    Hp = _round_up(hidden_size, 128)           # lane-dense hidden
    Op = _round_up(output_size, 128)           # lane-dense logits
    tb = block_rows if N >= block_rows else _round_up(max(N, 1), 8)
    Np = _round_up(N, tb)

    xp = jnp.pad(x_rows.astype(jnp.float32), ((0, Np - N), (0, 0)))
    w1p = jnp.pad(w1.astype(jnp.float32), ((0, 0), (0, Hp - hidden_size)))
    b1p = jnp.pad(b1.reshape(1, -1).astype(jnp.float32), ((0, 0), (0, Hp - hidden_size)))
    w2p = jnp.pad(w2.astype(jnp.float32), ((0, Hp - hidden_size), (0, Op - output_size)))
    # Padded logit columns get a very negative bias -> exp() == 0 in the softmax denominator.
    b2p = jnp.pad(b2.reshape(1, -1).astype(jnp.float32), ((0, 0), (0, Op - output_size)),
                  constant_values=-1e30)

    kernel = functools.partial(_namegen_kernel, mxu_dtype=mxu_dtype)
    out_p, hid_p = pl.pallas_call(
        kernel,
        out_shape=(
            jax.ShapeDtypeStruct((Np, Op), jnp.float32),
            jax.ShapeDtypeStruct((Np, Hp), jnp.float32),
        ),
        grid=(Np // tb,),
        in_specs=[
            pl.BlockSpec((tb, input_size), lambda i: (i, 0)),
            # Weights/biases: constant block index -> fetched once, stay resident in VMEM.
            pl.BlockSpec((input_size, Hp), lambda i: (0, 0)),
            pl.BlockSpec((1, Hp), lambda i: (0, 0)),
            pl.BlockSpec((Hp, Op), lambda i: (0, 0)),
            pl.BlockSpec((1, Op), lambda i: (0, 0)),
        ],
        out_specs=(
            pl.BlockSpec((tb, Op), lambda i: (i, 0)),
            pl.BlockSpec((tb, Hp), lambda i: (i, 0)),
        ),
        compiler_params=pltpu.CompilerParams(dimension_semantics=("parallel",)),
    )(xp, w1p, b1p, w2p, b2p)

    return out_p[:N, :output_size], hid_p[:N, :hidden_size]


def rnn_namegen_forward(x, hidden_unused, w1, b1, w2, b2, *, mxu_dtype=jnp.float32):
    """Pallas equivalent of one Net.forward(input, hidden) -> (output, hidden).
    Note: the reference forward overwrites `hidden`; the incoming value is unused."""
    return _forward_rows(x, w1, b1, w2, b2, mxu_dtype=mxu_dtype)


def rnn_namegen_forward_sequence(xs, hidden0_unused, w1, b1, w2, b2, *, mxu_dtype=jnp.float32):
    """Run Net.forward for every timestep of xs (T, B, input_size) in ONE pallas_call.

    Because the PyTorch forward never reads the carried hidden (it is overwritten from the
    current input), the T per-step calls are independent and can be flattened into the batch
    dimension, amortizing launch/DMA overhead across the whole sequence.
    Returns (outputs (T, B, output_size), last hidden (B, hidden_size)).
    """
    T, B, input_size = xs.shape
    out, hid = _forward_rows(xs.reshape(T * B, input_size), w1, b1, w2, b2, mxu_dtype=mxu_dtype)
    out = out.reshape(T, B, -1)
    hid = hid.reshape(T, B, -1)
    return out, hid[-1]


if __name__ == "__main__":
    key = jax.random.PRNGKey(0)
    T, B = 8, 2
    input_size, hidden_size, output_size = 16, 32, 24

    k_x, k_w1, k_b1, k_w2, k_b2 = jax.random.split(key, 5)
    xs = jax.random.normal(k_x, (T, B, input_size), dtype=jnp.float32)
    hidden0 = jnp.zeros((B, hidden_size), dtype=jnp.float32)  # initHidden()

    # PyTorch Linear stores W as (out, in); we keep it pre-transposed as (in, out).
    w1 = 0.1 * jax.random.normal(k_w1, (input_size, hidden_size), dtype=jnp.float32)
    b1 = 0.1 * jax.random.normal(k_b1, (1, hidden_size), dtype=jnp.float32)
    w2 = 0.1 * jax.random.normal(k_w2, (hidden_size, output_size), dtype=jnp.float32)
    b2 = 0.1 * jax.random.normal(k_b2, (1, output_size), dtype=jnp.float32)

    # Single-step call (exact Net.forward semantics).
    out0, hid0 = rnn_namegen_forward(xs[0], hidden0, w1, b1, w2, b2)
    # Fused whole-sequence call: all T steps in one pallas_call.
    out_seq, hid_last = rnn_namegen_forward_sequence(xs, hidden0, w1, b1, w2, b2)
    jax.block_until_ready((out0, hid0, out_seq, hid_last))

    # Pure-JAX reference.
    def ref_step(x):
        h = jnp.maximum(x @ w1 + b1, 0.0)
        return jax.nn.log_softmax(h @ w2 + b2, axis=1), h

    out_ref0, hid_ref0 = ref_step(xs[0])
    out_ref_seq = jnp.stack([ref_step(xs[t])[0] for t in range(T)])
    hid_ref_last = ref_step(xs[-1])[1]

    assert jnp.allclose(out0, out_ref0, atol=1e-5), "single-step output mismatch"
    assert jnp.allclose(hid0, hid_ref0, atol=1e-5), "single-step hidden mismatch"
    assert jnp.allclose(out_seq, out_ref_seq, atol=1e-5), "sequence output mismatch"
    assert jnp.allclose(hid_last, hid_ref_last, atol=1e-5), "sequence hidden mismatch"

    # bf16 MXU path (v6e/v7x): matmul operands in bf16, accumulation + VPU/EUP math in f32.
    out_bf16, _ = rnn_namegen_forward_sequence(xs, hidden0, w1, b1, w2, b2,
                                               mxu_dtype=jnp.bfloat16)
    jax.block_until_ready(out_bf16)
    assert jnp.allclose(out_bf16, out_ref_seq, atol=5e-2), "bf16 sequence output mismatch"

    print("KERNEL_OK")
</pallas_src>

<mosaic_0001>
module attributes {stable_mosaic.version = 11 : i64} {
  func.func @_namegen_kernel(%arg0: i32, %arg1: memref<8x16xf32, #tpu.memory_space<vmem>>, %arg2: memref<16x128xf32, #tpu.memory_space<vmem>>, %arg3: memref<1x128xf32, #tpu.memory_space<vmem>>, %arg4: memref<128x128xf32, #tpu.memory_space<vmem>>, %arg5: memref<1x128xf32, #tpu.memory_space<vmem>>, %arg6: memref<8x128xf32, #tpu.memory_space<vmem>>, %arg7: memref<8x128xf32, #tpu.memory_space<vmem>>) attributes {dimension_semantics = [#tpu.dimension_semantics<parallel>], iteration_bounds = array<i64: 1>, scalar_prefetch = 0 : i64, scratch_operands = 0 : i64, tpu.core_type = #tpu.core_type<tc>, window_params = [{transform_indices = @transform_0, window_bounds = array<i64: 8, 16>}, {pipeline_mode = #tpu.pipeline_mode<synchronous>, transform_indices = @transform_1, window_bounds = array<i64: 16, 128>}, {pipeline_mode = #tpu.pipeline_mode<synchronous>, transform_indices = @transform_2, window_bounds = array<i64: 1, 128>}, {pipeline_mode = #tpu.pipeline_mode<synchronous>, transform_indices = @transform_3, window_bounds = array<i64: 128, 128>}, {pipeline_mode = #tpu.pipeline_mode<synchronous>, transform_indices = @transform_4, window_bounds = array<i64: 1, 128>}, {transform_indices = @transform_5, window_bounds = array<i64: 8, 128>}, {transform_indices = @transform_6, window_bounds = array<i64: 8, 128>}]} {
    %c0 = arith.constant 0 : index
    %c0_0 = arith.constant 0 : index
    %0 = vector.load %arg1[%c0, %c0_0] : memref<8x16xf32, #tpu.memory_space<vmem>>, vector<8x16xf32>
    %c0_1 = arith.constant 0 : index
    %c0_2 = arith.constant 0 : index
    %1 = vector.load %arg2[%c0_1, %c0_2] : memref<16x128xf32, #tpu.memory_space<vmem>>, vector<16x128xf32>
    %cst = arith.constant dense<0.000000e+00> : vector<8x128xf32>
    %2 = tpu.matmul %0, %1, %cst {dimension_numbers = #tpu.dot_dimension_numbers<[1], [0], [0], [1], [0, 0, 1, 1], [], []>} : vector<8x16xf32>, vector<16x128xf32>, vector<8x128xf32> -> vector<8x128xf32>
    %c0_3 = arith.constant 0 : index
    %c0_4 = arith.constant 0 : index
    %3 = vector.load %arg3[%c0_3, %c0_4] : memref<1x128xf32, #tpu.memory_space<vmem>>, vector<1x128xf32>
    %4 = vector.broadcast %3 : vector<1x128xf32> to vector<8x128xf32>
    %5 = arith.addf %2, %4 : vector<8x128xf32>
    %cst_5 = arith.constant 0.000000e+00 : f32
    %6 = vector.broadcast %cst_5 : f32 to vector<8x128xf32>
    %7 = arith.maximumf %5, %6 : vector<8x128xf32>
    %c0_6 = arith.constant 0 : index
    %c0_7 = arith.constant 0 : index
    %8 = vector.load %arg7[%c0_6, %c0_7] : memref<8x128xf32, #tpu.memory_space<vmem>>, vector<8x128xf32>
    tpu.vector_store %arg7[%c0_6, %c0_7], %7 {strides = array<i32>} : memref<8x128xf32, #tpu.memory_space<vmem>>, vector<8x128xf32>,
    %c0_8 = arith.constant 0 : index
    %c0_9 = arith.constant 0 : index
    %9 = vector.load %arg4[%c0_8, %c0_9] : memref<128x128xf32, #tpu.memory_space<vmem>>, vector<128x128xf32>
    %cst_10 = arith.constant dense<0.000000e+00> : vector<8x128xf32>
    %10 = tpu.matmul %7, %9, %cst_10 {dimension_numbers = #tpu.dot_dimension_numbers<[1], [0], [0], [1], [0, 0, 1, 1], [], []>} : vector<8x128xf32>, vector<128x128xf32>, vector<8x128xf32> -> vector<8x128xf32>
    %c0_11 = arith.constant 0 : index
    %c0_12 = arith.constant 0 : index
    %11 = vector.load %arg5[%c0_11, %c0_12] : memref<1x128xf32, #tpu.memory_space<vmem>>, vector<1x128xf32>
    %12 = vector.broadcast %11 : vector<1x128xf32> to vector<8x128xf32>
    %13 = arith.addf %10, %12 : vector<8x128xf32>
    %cst_13 = arith.constant dense<0xFF800000> : vector<8xf32>
    %14 = vector.multi_reduction <maximumf>, %13, %cst_13 [1] : vector<8x128xf32> to vector<8xf32>
    %15 = vector.shape_cast %14 : vector<8xf32> to vector<8x1xf32>
    %16 = vector.broadcast %15 : vector<8x1xf32> to vector<8x128xf32>
    %17 = arith.subf %13, %16 : vector<8x128xf32>
    %18 = math.exp %17 : vector<8x128xf32>
    %cst_14 = arith.constant dense<0.000000e+00> : vector<8xf32>
    %19 = vector.multi_reduction <add>, %18, %cst_14 [1] : vector<8x128xf32> to vector<8xf32>
    %20 = vector.shape_cast %19 : vector<8xf32> to vector<8x1xf32>
    %21 = math.log %20 : vector<8x1xf32>
    %22 = arith.addf %15, %21 : vector<8x1xf32>
    %23 = vector.broadcast %22 : vector<8x1xf32> to vector<8x128xf32>
    %24 = arith.subf %13, %23 : vector<8x128xf32>
    %c0_15 = arith.constant 0 : index
    %c0_16 = arith.constant 0 : index
    %25 = vector.load %arg6[%c0_15, %c0_16] : memref<8x128xf32, #tpu.memory_space<vmem>>, vector<8x128xf32>
    tpu.vector_store %arg6[%c0_15, %c0_16], %24 {strides = array<i32>} : memref<8x128xf32, #tpu.memory_space<vmem>>, vector<8x128xf32>,
    return
  }
  func.func @transform_0(%arg0: i32) -> (i32, i32) {
    %c0_i32 = arith.constant 0 : i32
    %c0_i32_0 = arith.constant 0 : i32
    return %arg0, %c0_i32 : i32, i32
  }
  func.func @transform_1(%arg0: i32) -> (i32, i32) {
    %c0_i32 = arith.constant 0 : i32
    %c0_i32_0 = arith.constant 0 : i32
    %c0_i32_1 = arith.constant 0 : i32
    return %c0_i32, %c0_i32_0 : i32, i32
  }
  func.func @transform_2(%arg0: i32) -> (i32, i32) {
    %c0_i32 = arith.constant 0 : i32
    %c0_i32_0 = arith.constant 0 : i32
    %c0_i32_1 = arith.constant 0 : i32
    return %c0_i32, %c0_i32_0 : i32, i32
  }
  func.func @transform_3(%arg0: i32) -> (i32, i32) {
    %c0_i32 = arith.constant 0 : i32
    %c0_i32_0 = arith.constant 0 : i32
    %c0_i32_1 = arith.constant 0 : i32
    return %c0_i32, %c0_i32_0 : i32, i32
  }
  func.func @transform_4(%arg0: i32) -> (i32, i32) {
    %c0_i32 = arith.constant 0 : i32
    %c0_i32_0 = arith.constant 0 : i32
    %c0_i32_1 = arith.constant 0 : i32
    return %c0_i32, %c0_i32_0 : i32, i32
  }
  func.func @transform_5(%arg0: i32) -> (i32, i32) {
    %c0_i32 = arith.constant 0 : i32
    %c0_i32_0 = arith.constant 0 : i32
    return %arg0, %c0_i32 : i32, i32
  }
  func.func @transform_6(%arg0: i32) -> (i32, i32) {
    %c0_i32 = arith.constant 0 : i32
    %c0_i32_0 = arith.constant 0 : i32
    return %arg0, %c0_i32 : i32, i32
  }
}

</mosaic_0001>

<bundles_post_ra>
// kernel: tpu_custom_call.1
= control target key start
LH: loop header
LB: loop body
LE: loop exit
PB: predicated region body
PF: predicated region fallthrough
CT: control target
= control target key end

     0   :  { %12 = vsyncpa [#allocation3], 0  ;;  %s625_s0 = inlined_call_operand.hbm [shape: f32[8,16], index: 0, kind: input, shape index: {}]   ;;  %s626_s1 = inlined_call_operand.hbm [shape: f32[16,128], index: 1, kind: input, shape index: {}]   ;;  %s627_s2 = inlined_call_operand.vmem [shape: f32[1,128], index: 2, kind: input, shape index: {}]   ;;  %s628_s3 = inlined_call_operand.hbm [shape: f32[128,128], index: 3, kind: input, shape index: {}]   ;;  %s629_s4 = inlined_call_operand.vmem [shape: f32[1,128], index: 4, kind: input, shape index: {}]   ;;  %s630_s5 = inlined_call_operand.hbm [shape: f32[8,128], index: 5, kind: output, shape index: {0}]   ;;  %s631_s6 = inlined_call_operand.hbm [shape: f32[8,128], index: 6, kind: output, shape index: {1}]  }
   0x1   :  { %13 = vsyncpa [#allocation6], 0 }
   0x2   :  { %14 = vsyncpa [#allocation4], 0 }
   0x3   :  { %15 = vsyncpa [#allocation10], 0  ;;  %s508_s21 = smov [#allocation5]   ;;  %s390_s25 = scalar_lea.hbm %s626_s1, 256 }
   0x4   :  { %s31_s22 = sshll.u32 %s508_s21, 4  ;;  %p391_p0 = scmp.ne.s32.totalorder %s626_s1, %s390_s25  ;;  %s32_s22 = int_to_ptr.vmem [resolvable:$true] %s31_s22 }
   0x5   :  { %p394_p1 = scmp.lt.u32.totalorder %s390_s25, %s626_s1 }
   0x7   :  { %p396_p2 = pnand %p394_p1, %p391_p0 }
   0x9   :  { %399 = shalt.err (!%p396_p2)
}
   0xa   :  { %s400_s30 = scalar_lea.vmem %s32_s22, 256  ;;  %p405_p4 = scmp.lt.s32.totalorder %s32_s22, %s32_s22 }
   0xb   :  { %p401_p3 = scmp.ne.s32.totalorder %s32_s22, %s400_s30  ;;  %p406_p5 = scmp.lt.s32.totalorder %s400_s30, %s400_s30 }
   0xd   :  { %p407_p6 = por %p406_p5, %p405_p4 }
   0xf   :  { %p408_p7 = pnand %p407_p6, %p401_p3 }
  0x11   :  { %411 = shalt.err (!%p408_p7)
}
  0x12   :  { %s509_s7 = smov 128   ;;  %s510_s8 = smov 8  }
  0x13   :  { %37 = dma.hbm_to_vmem [thread:$0]  %s626_s1, 256, %s32_s22, [#allocation6], %s509_s7, %s509_s7, %s510_s8  }
  0x14   :  { %s511_s11 = smov [#allocation2]   ;;  %s512_s13 = smov [#allocation7]  }
  0x15   :  { %s22_s12 = sshll.u32 %s511_s11, 4  ;;  %s45_s14 = sshll.u32 %s512_s13, 4  ;;  %s23_s12 = int_to_ptr.vmem [resolvable:$true] %s22_s12  ;;  %s46_s14 = int_to_ptr.vmem [resolvable:$true] %s45_s14 }
  0x16   :  { %s412_s17 = scalar_lea.hbm %s625_s0, 128 }
  0x17   :  { %p413_p8 = scmp.ne.s32.totalorder %s625_s0, %s412_s17  ;;  %p416_p9 = scmp.lt.u32.totalorder %s412_s17, %s625_s0 }
  0x19   :  { %p418_p10 = pnand %p416_p9, %p413_p8 }
  0x1b   :  { %421 = shalt.err (!%p418_p10)
}
  0x1c   :  { %s422_s1 = scalar_lea.vmem %s23_s12, 128  ;;  %p427_p12 = scmp.lt.s32.totalorder %s23_s12, %s23_s12 }
  0x1d   :  { %p423_p11 = scmp.ne.s32.totalorder %s23_s12, %s422_s1  ;;  %p428_p13 = scmp.lt.s32.totalorder %s422_s1, %s422_s1 }
  0x1f   :  { %p429_p0 = por %p428_p13, %p427_p12 }
  0x21   :  { %p430_p1 = pnand %p429_p0, %p423_p11 }
  0x23   :  { %433 = shalt.err (!%p430_p1)
}
  0x24   :  { %25 = dma.hbm_to_vmem [thread:$0]  %s625_s0, 128, %s23_s12, [#allocation3]  }
  0x25   :  { %s434_s26 = scalar_lea.hbm %s628_s3, 2048 }
  0x26   :  { %p435_p2 = scmp.ne.s32.totalorder %s628_s3, %s434_s26  ;;  %p438_p3 = scmp.lt.u32.totalorder %s434_s26, %s628_s3 }
  0x28   :  { %p440_p4 = pnand %p438_p3, %p435_p2 }
  0x2a   :  { %443 = shalt.err (!%p440_p4)
}
  0x2b   :  { %s444_s9 = scalar_lea.vmem %s46_s14, 2048  ;;  %p449_p6 = scmp.lt.s32.totalorder %s46_s14, %s46_s14 }
  0x2c   :  { %p445_p5 = scmp.ne.s32.totalorder %s46_s14, %s444_s9  ;;  %p450_p7 = scmp.lt.s32.totalorder %s444_s9, %s444_s9 }
  0x2e   :  { %p451_p8 = por %p450_p7, %p449_p6 }
  0x30   :  { %p452_p9 = pnand %p451_p8, %p445_p5 }
  0x32   :  { %455 = shalt.err (!%p452_p9)
}
  0x33   :  { %51 = dma.hbm_to_vmem [thread:$0]  %s628_s3, 2048, %s46_s14, [#allocation6], %s509_s7, %s509_s7, %s510_s8  }
  0x34   :  { %500 = dma.done.wait [#allocation3], 128  }
  0x35   :  { %501 = vsyncadd [#allocation3], 4294967168 }
  0x36   :  { %502 = dma.done.wait [#allocation6], 2304  }
  0x37   :  { %503 = vsyncadd [#allocation6], 4294964992  ;;  %v513_v0 = vmov 0.0|0.0   ;;  %vm514_vm0 = vmmov 0   ;;  %v515_v1 = vmov 0.0   ;;  %v64_v2 = vld [vmem:[#allocation5] sm:$0xff] }
  0x38   :  { %349 = vmatprep.subr.bf16.mxu0 %v513_v0  ;;  %311 = vmatprep.mubr.msk.f32.mxu0 %vm514_vm0, %v515_v1  ;;  %v65_v3 = vld [vmem:[#allocation5 + $0x8] sm:$0xff]  ;;  %v149_v5 = vld [vmem:[#allocation7] sm:$0xff]  ;;  %v150_v6 = vld [vmem:[#allocation7 + $0x8] sm:$0xff]  ;;  %vm73_vm1 = vcmask 130048  }
  0x39   :  { %352 = vmatprep.subr.bf16.mxu1 %v513_v0  ;;  %346 = vmatprep.mubr.msk.f32.mxu1 %vm514_vm0, %v515_v1  ;;  %v350_v4 = vpack.c.bf16 %v65_v3, %v64_v2  ;;  %v151_v7 = vld [vmem:[#allocation7 + $0x10] sm:$0xff]  ;;  %v353_v8 = vpack.c.bf16 %v150_v6, %v149_v5  ;;  %v152_v9 = vld [vmem:[#allocation7 + $0x18] sm:$0xff]  ;;  %v63_v10 = vld [vmem:[#allocation2] sm:$0xff] }
  0x3a   :  { %v356_v11 = vpack.c.bf16 %v152_v9, %v151_v7  ;;  %v153_v12 = vld [vmem:[#allocation7 + $0x20] sm:$0xff]  ;;  %v154_v13 = vld [vmem:[#allocation7 + $0x28] sm:$0xff]  ;;  %v155_v15 = vld [vmem:[#allocation7 + $0x30] sm:$0xff] }
  0x3b   :  { %351 = vmatpush3.bf16.msra.mxu0 %v350_v4  ;;  %354 = vmatpush3.bf16.msra.mxu1 %v353_v8  ;;  %v359_v14 = vpack.c.bf16 %v154_v13, %v153_v12  ;;  %v156_v16 = vld [vmem:[#allocation7 + $0x38] sm:$0xff]  ;;  %v157_v18 = vld [vmem:[#allocation7 + $0x40] sm:$0xff]  ;;  %v158_v19 = vld [vmem:[#allocation7 + $0x48] sm:$0xff] }
  0x3c   :  { %355 = vmatprep.subr.bf16.mxu1 %v513_v0  ;;  %v362_v17 = vpack.c.bf16 %v156_v16, %v155_v15  ;;  %v365_v20 = vpack.c.bf16 %v158_v19, %v157_v18  ;;  %v159_v21 = vld [vmem:[#allocation7 + $0x50] sm:$0xff]  ;;  %v160_v22 = vld [vmem:[#allocation7 + $0x58] sm:$0xff]  ;;  %v161_v24 = vld [vmem:[#allocation7 + $0x60] sm:$0xff] }
  0x3d   :  { %v368_v23 = vpack.c.bf16 %v160_v22, %v159_v21  ;;  %v162_v25 = vld [vmem:[#allocation7 + $0x68] sm:$0xff]  ;;  %v163_v27 = vld [vmem:[#allocation7 + $0x70] sm:$0xff]  ;;  %v164_v28 = vld [vmem:[#allocation7 + $0x78] sm:$0xff] }
  0x3e   :  { %312 = vmatmul.mubr.msk.f32.vlgmr.msra.gmra.mrb[0].mxu0 %vm73_vm1, %v63_v10  ;;  %v371_v26 = vpack.c.bf16 %v162_v25, %v161_v24  ;;  %v374_v29 = vpack.c.bf16 %v164_v28, %v163_v27  ;;  %v284_v30 = vld [vmem:[%s627_s2] ss:$0 sm:$0xff]  ;;  %s516_s2 = smov [#allocation9]  }
  0x3f   :  { %357 = vmatpush3.bf16.msra.mxu1 %v356_v11  ;;  %v286_v35 = vld [vmem:[%s629_s4] ss:$0 sm:$0xff]  ;;  %s270_s12 = sshll.u32 %s516_s2, 4  ;;  %s271_s12 = int_to_ptr.vmem [resolvable:$true] %s270_s12 }
  0x40   :  { %358 = vmatprep.subr.bf16.mxu1 %v513_v0  ;;  %s456_s13 = scalar_lea.vmem %s271_s12, 128  ;;  %p461_p11 = scmp.lt.s32.totalorder %s271_s12, %s271_s12 }
  0x41   :  { %p457_p10 = scmp.ne.s32.totalorder %s271_s12, %s456_s13  ;;  %p462_p12 = scmp.lt.s32.totalorder %s456_s13, %s456_s13 }
  0x43   :  { %360 = vmatpush3.bf16.msra.mxu1 %v359_v14  ;;  %p463_p13 = por %p462_p12, %p461_p11 }
  0x44   :  { %361 = vmatprep.subr.bf16.mxu1 %v513_v0 }
  0x45   :  { %p464_p0 = pnand %p463_p13, %p457_p10 }
  0x47   :  { %363 = vmatpush3.bf16.msra.mxu1 %v362_v17 }
  0x48   :  { %364 = vmatprep.subr.bf16.mxu1 %v513_v0 }
  0x4b   :  { %366 = vmatpush3.bf16.msra.mxu1 %v365_v20 }
  0x4c   :  { %367 = vmatprep.subr.bf16.mxu1 %v513_v0 }
  0x4f   :  { %369 = vmatpush3.bf16.msra.mxu1 %v368_v23 }
  0x50   :  { %370 = vmatprep.subr.bf16.mxu1 %v513_v0 }
  0x53   :  { %372 = vmatpush3.bf16.msra.mxu1 %v371_v26 }
  0x54   :  { %373 = vmatprep.subr.bf16.mxu1 %v513_v0 }
  0x57   :  { %375 = vmatpush3.bf16.msra.mxu1 %v374_v29 }
 0x111   :  { %v143_v31 = vpop.f32.mrb[0].mxu0 }
 0x112   :  { %v144_v32 = vadd.f32 %v284_v30, %v143_v31  ;;  %v313_v33 = vpop.f32.mrb[1].mxu0 }
 0x114   :  { %v147_v34 = vmax.f32 %v144_v32, 0.0 }
 0x116   :  { %148 = vst [vmem:[#allocation9] sm:$0xff] %v147_v34  ;;  %347 = vmatmul.mubr.f32.vlgmr.msra.gmra.mrb[0].mxu1 %v147_v34 }
 0x1e9   :  { %v238_v36 = vpop.f32.mrb[0].mxu1 }
 0x1ea   :  { %v239_v37 = vadd.f32 %v286_v35, %v238_v36  ;;  %v348_v38 = vpop.f32.mrb[1].mxu1 }
 0x1ec   :  { %242 = vmax.xlane.f32.xlu0 %v239_v37 }
 0x279   :  { %v243_v39 = vpop.xlane.xlu0 %242 }
 0x27a   :  { %v244_v40 = vsub.f32 %v239_v37, %v243_v39 }
 0x27c   :  { %v245_v41 = vmul.f32 1.442695, %v244_v40 }
 0x27e   :  { %386 = vpow2.f32 %v245_v41 }
 0x288   :  { %v387_v42 = vpop.eup %386 }
 0x289   :  { %247 = vadd.xlane.f32.xlu0 %v387_v42 }
 0x28a   :  { %467 = shalt.err (!%p464_p0)
}
 0x28b   :  { %s468_s15 = scalar_lea.hbm %s631_s6, 128 }
 0x28c   :  { %p469_p1 = scmp.ne.s32.totalorder %s631_s6, %s468_s15  ;;  %p472_p2 = scmp.lt.u32.totalorder %s468_s15, %s631_s6 }
 0x28e   :  { %p474_p3 = pnand %p472_p2, %p469_p1 }
 0x290   :  { %477 = shalt.err (!%p474_p3)
}
 0x291   :  { %273 = dma.vmem_to_hbm [thread:$0]  %s271_s12, 128, %s631_s6, [#allocation10]  }
 0x292   :  { %s517_s1 = smov [#allocation8]  }
 0x293   :  { %s260_s22 = sshll.u32 %s517_s1, 4  ;;  %s261_s22 = int_to_ptr.vmem [resolvable:$true] %s260_s22 }
 0x294   :  { %s478_s23 = scalar_lea.vmem %s261_s22, 128  ;;  %p483_p5 = scmp.lt.s32.totalorder %s261_s22, %s261_s22 }
 0x295   :  { %p479_p4 = scmp.ne.s32.totalorder %s261_s22, %s478_s23  ;;  %p484_p6 = scmp.lt.s32.totalorder %s478_s23, %s478_s23 }
 0x297   :  { %p485_p7 = por %p484_p6, %p483_p5 }
 0x299   :  { %p486_p8 = pnand %p485_p7, %p479_p4 }
 0x316   :  { %v248_v43 = vpop.xlane.xlu0 %247 }
 0x317   :  { %388 = vlog2.f32 %v248_v43 }
 0x321   :  { %v389_v44 = vpop.eup %388 }
 0x322   :  { %v250_v45 = vmul.f32 0.6931472, %v389_v44 }
 0x324   :  { %v251_v46 = vadd.f32 %v250_v45, %v243_v39 }
 0x326   :  { %v252_v47 = vsub.f32 %v239_v37, %v251_v46 }
 0x328   :  { %253 = vst [vmem:[#allocation8] sm:$0xff] %v252_v47 }
 0x329   :  { %489 = shalt.err (!%p486_p8)
}
 0x32a   :  { %s490_s6 = scalar_lea.hbm %s630_s5, 128 }
 0x32b   :  { %p491_p9 = scmp.ne.s32.totalorder %s630_s5, %s490_s6  ;;  %p494_p10 = scmp.lt.u32.totalorder %s490_s6, %s630_s5 }
 0x32d   :  { %p496_p11 = pnand %p494_p10, %p491_p9 }
 0x32f   :  { %499 = shalt.err (!%p496_p11)
}
 0x330   :  { %263 = dma.vmem_to_hbm [thread:$0]  %s261_s22, 128, %s630_s5, [#allocation4]  }
 0x331   :  { %504 = dma.done.wait [#allocation4], 128  }
 0x332   :  { %505 = vsyncadd [#allocation4], 4294967168 }
 0x333   :  { %506 = dma.done.wait [#allocation10], 128  }
 0x334   :  { %507 = vsyncadd [#allocation10], 4294967168 }
 0x335   :  { %280 = vsyncpa [#allocation3], 1 }
 0x336   :  { %281 = vsyncpa [#allocation6], 1 }
 0x337   :  { %282 = vsyncpa [#allocation4], 1 }
 0x338   :  { %283 = vsyncpa [#allocation10], 1 }

</bundles_post_ra>
